<compile_context>
chip_gen: v7x
topology: tpu7x:2x2x1
jax: 0.10.0
libtpu: 0.0.40
codegen_flags: <defaults>
</compile_context>

<pallas_src>
import jax
import jax.numpy as jnp
from jax.experimental import pallas as pl
from jax.experimental.pallas import tpu as pltpu


def mclru_kernel(mean_ref, logstd_ref, eps_ref, w_ref, b_ref, out_ref):
    # mean_ref/logstd_ref: [TN, dim]; eps_ref: [R, TN, dim];
    # w_ref: [dim, C]; b_ref: [1, C]; out_ref: [R, TN, C]
    R, TN, dim = eps_ref.shape
    C = w_ref.shape[1]

    # exp(log_std) once per N-tile (R-invariant -> no redundant EUP work).
    std = jnp.exp(logstd_ref[...])                                    # [TN, dim]

    # Fused reparameterization, broadcast over the R Monte-Carlo samples.
    x1 = mean_ref[...][None, :, :] + eps_ref[...] * std[None, :, :]   # [R, TN, dim]

    # Fold R into the matmul M dimension: one MXU pass over R*TN rows.
    x1_2d = x1.reshape(R * TN, dim)
    logits = jnp.dot(x1_2d, w_ref[...],
                     preferred_element_type=jnp.float32)              # [R*TN, C]
    logits = logits + b_ref[...]                                      # bias [1, C]

    out_ref[...] = logits.reshape(R, TN, C)


def mclru_forward(X, eps, W, b, *, block_n=None):
    """X: [N, 2*dim] f32, eps: [R, N, dim], W: [dim, C], b: [1, C] -> [R, N, C]."""
    R, N, dim = eps.shape
    C = W.shape[1]
    mean = X[:, :dim]
    log_std = X[:, dim:]

    if block_n is None:
        # Whole batch in one tile when small; otherwise 512-row N-tiles
        # (keeps per-step VMEM footprint well under the v7x 64 MiB budget
        # even with R=128 double-buffered eps tiles).
        block_n = N if N <= 512 else 512
    assert N % block_n == 0, "block_n must divide N"
    assert block_n == N or block_n % 8 == 0, "block_n must be sublane-aligned"
    grid = (N // block_n,)

    return pl.pallas_call(
        mclru_kernel,
        out_shape=jax.ShapeDtypeStruct((R, N, C), jnp.float32),
        grid_spec=pltpu.PrefetchScalarGridSpec(
            num_scalar_prefetch=0,
            grid=grid,
            in_specs=[
                pl.BlockSpec((block_n, dim), lambda i: (i, 0)),        # mean tile
                pl.BlockSpec((block_n, dim), lambda i: (i, 0)),        # log_std tile
                pl.BlockSpec((R, block_n, dim), lambda i: (0, i, 0)),  # all R eps
                pl.BlockSpec((dim, C), lambda i: (0, 0)),              # W (invariant)
                pl.BlockSpec((1, C), lambda i: (0, 0)),                # b (invariant)
            ],
            out_specs=pl.BlockSpec((R, block_n, C), lambda i: (0, i, 0)),
        ),
        compiler_params=pltpu.CompilerParams(
            dimension_semantics=("parallel",),  # N-tiles independent -> 2 TCs on v7x
        ),
    )(mean, log_std, eps, W, b)


if __name__ == "__main__":
    # Small, forward-consistent shapes.
    dim = 32        # feature dimension
    n_classes = 8   # number of classes
    N = 8           # batch (n_samples)
    R = 4           # Monte-Carlo samples

    key = jax.random.PRNGKey(0)
    k_x, k_eps, k_w, k_b = jax.random.split(key, 4)

    # Input features: [N, 2*dim] = [mean ; log_std]. Keep log_std small-ish.
    X = jax.random.normal(k_x, (N, 2 * dim), dtype=jnp.float32) * 0.5

    # Monte-Carlo noise (PyTorch draws this inside forward via self.sample;
    # here it's drawn deterministically outside and fed to the kernel).
    eps = jax.random.normal(k_eps, (R, N, dim), dtype=jnp.float32)

    # Deterministic parameter init (xavier_uniform_ style bounds).
    w_bound = (6.0 / (dim + n_classes)) ** 0.5
    b_bound = (6.0 / (1 + n_classes)) ** 0.5
    W = jax.random.uniform(k_w, (dim, n_classes), jnp.float32, -w_bound, w_bound)
    b = jax.random.uniform(k_b, (1, n_classes), jnp.float32, -b_bound, b_bound)

    logits = mclru_forward(X, eps, W, b)
    logits = jax.block_until_ready(logits)

    # Sanity check against a pure-JAX reference of the same math.
    mean, log_std = X[:, :dim], X[:, dim:]
    x1_ref = mean[None, :, :] + eps * jnp.exp(log_std)[None, :, :]
    ref = jnp.einsum("rnd,dc->rnc", x1_ref, W) + b[None, :, :]
    assert logits.shape == (R, N, n_classes)
    assert jnp.allclose(logits, ref, atol=1e-5, rtol=1e-5)

    print("KERNEL_OK")
</pallas_src>

<mosaic_0001>
module attributes {stable_mosaic.version = 11 : i64} {
  func.func @mclru_kernel(%arg0: i32, %arg1: memref<8x32xf32, #tpu.memory_space<vmem>>, %arg2: memref<8x32xf32, #tpu.memory_space<vmem>>, %arg3: memref<4x8x32xf32, #tpu.memory_space<vmem>>, %arg4: memref<32x8xf32, #tpu.memory_space<vmem>>, %arg5: memref<1x8xf32, #tpu.memory_space<vmem>>, %arg6: memref<4x8x8xf32, #tpu.memory_space<vmem>>) attributes {dimension_semantics = [#tpu.dimension_semantics<parallel>], iteration_bounds = array<i64: 1>, scalar_prefetch = 0 : i64, scratch_operands = 0 : i64, tpu.core_type = #tpu.core_type<tc>, window_params = [{transform_indices = @transform_0, window_bounds = array<i64: 8, 32>}, {transform_indices = @transform_1, window_bounds = array<i64: 8, 32>}, {transform_indices = @transform_2, window_bounds = array<i64: 4, 8, 32>}, {pipeline_mode = #tpu.pipeline_mode<synchronous>, transform_indices = @transform_3, window_bounds = array<i64: 32, 8>}, {pipeline_mode = #tpu.pipeline_mode<synchronous>, transform_indices = @transform_4, window_bounds = array<i64: 1, 8>}, {transform_indices = @transform_5, window_bounds = array<i64: 4, 8, 8>}]} {
    %c0 = arith.constant 0 : index
    %c0_0 = arith.constant 0 : index
    %0 = vector.load %arg2[%c0, %c0_0] : memref<8x32xf32, #tpu.memory_space<vmem>>, vector<8x32xf32>
    %1 = math.exp %0 : vector<8x32xf32>
    %c0_1 = arith.constant 0 : index
    %c0_2 = arith.constant 0 : index
    %2 = vector.load %arg1[%c0_1, %c0_2] : memref<8x32xf32, #tpu.memory_space<vmem>>, vector<8x32xf32>
    %3 = vector.shape_cast %2 : vector<8x32xf32> to vector<1x8x32xf32>
    %c0_3 = arith.constant 0 : index
    %c0_4 = arith.constant 0 : index
    %c0_5 = arith.constant 0 : index
    %4 = vector.load %arg3[%c0_3, %c0_4, %c0_5] : memref<4x8x32xf32, #tpu.memory_space<vmem>>, vector<4x8x32xf32>
    %5 = vector.shape_cast %1 : vector<8x32xf32> to vector<1x8x32xf32>
    %6 = vector.broadcast %5 : vector<1x8x32xf32> to vector<4x8x32xf32>
    %7 = arith.mulf %4, %6 : vector<4x8x32xf32>
    %8 = vector.broadcast %3 : vector<1x8x32xf32> to vector<4x8x32xf32>
    %9 = arith.addf %8, %7 : vector<4x8x32xf32>
    %10 = vector.shape_cast %9 : vector<4x8x32xf32> to vector<32x32xf32>
    %c0_6 = arith.constant 0 : index
    %c0_7 = arith.constant 0 : index
    %11 = vector.load %arg4[%c0_6, %c0_7] : memref<32x8xf32, #tpu.memory_space<vmem>>, vector<32x8xf32>
    %cst = arith.constant dense<0.000000e+00> : vector<32x8xf32>
    %12 = tpu.matmul %10, %11, %cst {dimension_numbers = #tpu.dot_dimension_numbers<[1], [0], [0], [1], [0, 0, 1, 1], [], []>} : vector<32x32xf32>, vector<32x8xf32>, vector<32x8xf32> -> vector<32x8xf32>
    %c0_8 = arith.constant 0 : index
    %c0_9 = arith.constant 0 : index
    %13 = vector.load %arg5[%c0_8, %c0_9] : memref<1x8xf32, #tpu.memory_space<vmem>>, vector<1x8xf32>
    %14 = vector.broadcast %13 : vector<1x8xf32> to vector<32x8xf32>
    %15 = arith.addf %12, %14 : vector<32x8xf32>
    %16 = vector.shape_cast %15 : vector<32x8xf32> to vector<4x8x8xf32>
    %c0_10 = arith.constant 0 : index
    %c0_11 = arith.constant 0 : index
    %c0_12 = arith.constant 0 : index
    %17 = vector.load %arg6[%c0_10, %c0_11, %c0_12] : memref<4x8x8xf32, #tpu.memory_space<vmem>>, vector<4x8x8xf32>
    tpu.vector_store %arg6[%c0_10, %c0_11, %c0_12], %16 {strides = array<i32>} : memref<4x8x8xf32, #tpu.memory_space<vmem>>, vector<4x8x8xf32>,
    return
  }
  func.func @transform_0(%arg0: i32) -> (i32, i32) {
    %c0_i32 = arith.constant 0 : i32
    %c0_i32_0 = arith.constant 0 : i32
    return %arg0, %c0_i32 : i32, i32
  }
  func.func @transform_1(%arg0: i32) -> (i32, i32) {
    %c0_i32 = arith.constant 0 : i32
    %c0_i32_0 = arith.constant 0 : i32
    return %arg0, %c0_i32 : i32, i32
  }
  func.func @transform_2(%arg0: i32) -> (i32, i32, i32) {
    %c0_i32 = arith.constant 0 : i32
    %c0_i32_0 = arith.constant 0 : i32
    %c0_i32_1 = arith.constant 0 : i32
    return %c0_i32, %arg0, %c0_i32_0 : i32, i32, i32
  }
  func.func @transform_3(%arg0: i32) -> (i32, i32) {
    %c0_i32 = arith.constant 0 : i32
    %c0_i32_0 = arith.constant 0 : i32
    %c0_i32_1 = arith.constant 0 : i32
    return %c0_i32, %c0_i32_0 : i32, i32
  }
  func.func @transform_4(%arg0: i32) -> (i32, i32) {
    %c0_i32 = arith.constant 0 : i32
    %c0_i32_0 = arith.constant 0 : i32
    %c0_i32_1 = arith.constant 0 : i32
    return %c0_i32, %c0_i32_0 : i32, i32
  }
  func.func @transform_5(%arg0: i32) -> (i32, i32, i32) {
    %c0_i32 = arith.constant 0 : i32
    %c0_i32_0 = arith.constant 0 : i32
    %c0_i32_1 = arith.constant 0 : i32
    return %c0_i32, %arg0, %c0_i32_0 : i32, i32, i32
  }
}

</mosaic_0001>

<bundles_post_ra>
// kernel: tpu_custom_call.1
= control target key start
LH: loop header
LB: loop body
LE: loop exit
PB: predicated region body
PF: predicated region fallthrough
CT: control target
= control target key end

     0   :  { %10 = vsyncpa [#allocation3], 0  ;;  %s361_s0 = inlined_call_operand.vmem [shape: f32[8,32], index: 0, kind: input, shape index: {}]   ;;  %s362_s1 = inlined_call_operand.hbm [shape: f32[8,32], index: 1, kind: input, shape index: {}]   ;;  %s363_s2 = inlined_call_operand.vmem [shape: f32[4,8,32], index: 2, kind: input, shape index: {}]   ;;  %s364_s3 = inlined_call_operand.vmem [shape: f32[32,8], index: 3, kind: input, shape index: {}]   ;;  %s365_s4 = inlined_call_operand.vmem [shape: f32[1,8], index: 4, kind: input, shape index: {}]   ;;  %s366_s5 = inlined_call_operand.hbm [shape: f32[4,8,8], index: 5, kind: output, shape index: {}]  }
   0x1   :  { %11 = vsyncpa [#allocation4], 0  ;;  %s273_s18 = smov [#allocation2]   ;;  %s225_s22 = scalar_lea.hbm %s362_s1, 128 }
   0x2   :  { %s20_s19 = sshll.u32 %s273_s18, 4  ;;  %p226_p0 = scmp.ne.s32.totalorder %s362_s1, %s225_s22  ;;  %s21_s19 = int_to_ptr.vmem [resolvable:$true] %s20_s19 }
   0x3   :  { %p229_p1 = scmp.lt.u32.totalorder %s225_s22, %s362_s1 }
   0x5   :  { %p231_p2 = pnand %p229_p1, %p226_p0 }
   0x7   :  { %234 = shalt.err (!%p231_p2)
}
   0x8   :  { %s235_s27 = scalar_lea.vmem %s21_s19, 128  ;;  %p240_p4 = scmp.lt.s32.totalorder %s21_s19, %s21_s19 }
   0x9   :  { %p236_p3 = scmp.ne.s32.totalorder %s21_s19, %s235_s27  ;;  %p241_p5 = scmp.lt.s32.totalorder %s235_s27, %s235_s27 }
   0xb   :  { %p242_p6 = por %p241_p5, %p240_p4 }
   0xd   :  { %p243_p7 = pnand %p242_p6, %p236_p3 }
   0xf   :  { %246 = shalt.err (!%p243_p7)
}
  0x10   :  { %23 = dma.hbm_to_vmem [thread:$0]  %s362_s1, 128, %s21_s19, [#allocation3]  }
  0x11   :  { %269 = dma.done.wait [#allocation3], 128  }
  0x12   :  { %270 = vsyncadd [#allocation3], 4294967168  ;;  %v49_v0 = vld [vmem:[%s364_s3] sm:$0xff]  ;;  %v50_v1 = vld [vmem:[%s364_s3 + $0x8] sm:$0xff]  ;;  %vm60_vm0 = vcmask 261120   ;;  %s274_s22 = smov [#allocation5]  }
  0x13   :  { %v51_v2 = vld [vmem:[%s364_s3 + $0x10] sm:$0xff]  ;;  %v207_v3 = vpack.c.bf16 %v50_v1, %v49_v0  ;;  %v52_v4 = vld [vmem:[%s364_s3 + $0x18] sm:$0xff]  ;;  %v33_v5 = vld [vmem:[#allocation2] sm:$0xff]  ;;  %s168_s23 = sshll.u32 %s274_s22, 4  ;;  %vm158_vm1 = vcmask 64512   ;;  %s169_s23 = int_to_ptr.vmem [resolvable:$true] %s168_s23 }
  0x14   :  { %v211_v6 = vpack.c.bf16 %v52_v4, %v51_v2  ;;  %v34_v7 = vmul.f32 1.442695, %v33_v5  ;;  %v37_v8 = vld [vmem:[%s363_s2] sm:$0xff]  ;;  %v39_v9 = vld [vmem:[%s363_s2 + $0x10] sm:$0xff]  ;;  %v38_v10 = vld [vmem:[%s363_s2 + $0x8] sm:$0xff]  ;;  %p252_p9 = scmp.lt.s32.totalorder %s169_s23, %s169_s23 }
  0x15   :  { %208 = vmatprep.subr.bf16.mxu0 %v207_v3  ;;  %215 = vmatprep.subr.bf16.mxu1 %v207_v3  ;;  %v40_v11 = vld [vmem:[%s363_s2 + $0x18] sm:$0xff]  ;;  %v36_v13 = vld [vmem:[%s361_s0] sm:$0xff]  ;;  %s247_s0 = scalar_lea.vmem %s169_s23, 512 }
  0x16   :  { %210 = vmatpush3.bf16.msra.mxu0 %v207_v3  ;;  %217 = vmatpush3.bf16.msra.mxu1 %v207_v3  ;;  %223 = vpow2.f32 %v34_v7  ;;  %v180_v22 = vld [vmem:[%s365_s4] ss:$0 sm:$0xff]  ;;  %p248_p8 = scmp.ne.s32.totalorder %s169_s23, %s247_s0  ;;  %p253_p10 = scmp.lt.s32.totalorder %s247_s0, %s247_s0 }
  0x17   :  { %212 = vmatprep.subr.bf16.mxu0 %v211_v6  ;;  %216 = vmatprep.subr.bf16.mxu1 %v211_v6 }
  0x18   :  { %p254_p11 = por %p253_p10, %p252_p9 }
  0x1a   :  { %214 = vmatpush3.bf16.msra.mxu0 %v211_v6  ;;  %218 = vmatpush3.bf16.msra.mxu1 %v211_v6  ;;  %p255_p12 = pnand %p254_p11, %p248_p8 }
  0x20   :  { %v224_v12 = vpop.eup %223 }
  0x21   :  { %v41_v14 = vmul.f32 %v224_v12, %v37_v8  ;;  %v43_v15 = vmul.f32 %v224_v12, %v39_v9  ;;  %v42_v16 = vmul.f32 %v224_v12, %v38_v10  ;;  %v44_v17 = vmul.f32 %v224_v12, %v40_v11 }
  0x23   :  { %v45_v18 = vadd.f32 %v41_v14, %v36_v13  ;;  %v47_v19 = vadd.f32 %v43_v15, %v36_v13  ;;  %v46_v20 = vadd.f32 %v42_v16, %v36_v13  ;;  %v48_v21 = vadd.f32 %v44_v17, %v36_v13 }
  0x25   :  { %201 = vmatprep.mubr.msk.f32.mxu0 %vm60_vm0, %v45_v18  ;;  %204 = vmatprep.mubr.msk.f32.mxu1 %vm60_vm0, %v47_v19 }
  0x26   :  { %202 = vmatmul.mubr.msk.f32.vlgmr.msra.gmra.mrb[0].mxu0 %vm60_vm0, %v46_v20  ;;  %205 = vmatmul.mubr.msk.f32.vlgmr.msra.gmra.mrb[0].mxu1 %vm60_vm0, %v48_v21 }
  0xf9   :  { %v203_v23 = vpop.f32.mrb[0].mxu0  ;;  %v206_v24 = vpop.f32.mrb[0].mxu1 }
  0xfa   :  { %v145_v25 = vadd.f32 %v203_v23, %v180_v22  ;;  %v155_v26 = vadd.f32 %v206_v24, %v180_v22  ;;  %v139_v27 = vpop.f32.mrb[1].mxu0  ;;  %v149_v28 = vpop.f32.mrb[1].mxu1 }
  0xfb   :  { %v140_v29 = vadd.f32 %v180_v22, %v139_v27  ;;  %v150_v30 = vadd.f32 %v180_v22, %v149_v28 }
  0xfc   :  { %160 = vst.msk [vmem:[#allocation5 + $0x8] sm:$0xff] %vm158_vm1, %v145_v25  ;;  %162 = vst.msk [vmem:[#allocation5 + $0x18] sm:$0xff] %vm158_vm1, %v155_v26 }
  0xfd   :  { %159 = vst.msk [vmem:[#allocation5] sm:$0xff] %vm158_vm1, %v140_v29  ;;  %161 = vst.msk [vmem:[#allocation5 + $0x10] sm:$0xff] %vm158_vm1, %v150_v30 }
  0xfe   :  { %258 = shalt.err (!%p255_p12)
}
  0xff   :  { %s259_s25 = scalar_lea.hbm %s366_s5, 512 }
 0x100   :  { %p260_p13 = scmp.ne.s32.totalorder %s366_s5, %s259_s25  ;;  %p263_p0 = scmp.lt.u32.totalorder %s259_s25, %s366_s5 }
 0x102   :  { %p265_p1 = pnand %p263_p0, %p260_p13 }
 0x104   :  { %268 = shalt.err (!%p265_p1)
}
 0x105   :  { %s275_s30 = smov 128   ;;  %s276_s6 = smov 8  }
 0x106   :  { %174 = dma.vmem_to_hbm [thread:$0]  %s169_s23, 512, %s366_s5, [#allocation4], %s275_s30, %s275_s30, %s276_s6  }
 0x107   :  { %271 = dma.done.wait [#allocation4], 512  }
 0x108   :  { %272 = vsyncadd [#allocation4], 4294966784 }
 0x109   :  { %178 = vsyncpa [#allocation3], 1 }
 0x10a   :  { %179 = vsyncpa [#allocation4], 1 }

</bundles_post_ra>
